<compile_context>
chip_gen: v6e
topology: v6e:2x2x1
jax: 0.10.0
libtpu: 0.0.40
codegen_flags: <defaults>
</compile_context>

<pallas_src>
import jax
import jax.numpy as jnp
from jax.experimental import pallas as pl
from jax.experimental.pallas import tpu as pltpu


def _round_up(x, m):
    return ((x + m - 1) // m) * m


# ----------------------------------------------------------------------------
# Kernel 1: fused row-wise dot product + sigmoid            (PureMF.forward)
# ----------------------------------------------------------------------------
def _score_kernel(u_ref, i_ref, o_ref):
    # u_ref, i_ref: (TB, D) — gathered embedding rows, straight from the gather
    #   (no wrapper-side transpose materialized in HBM).
    # o_ref: (1, TB) — lane-dense output tile (unmasked vector stores).
    u = u_ref[...].astype(jnp.float32)
    v = i_ref[...].astype(jnp.float32)
    p = u * v                                                   # (TB, D)  VPU
    # One MXU op does the reduction over D *and* moves the per-row scalars onto
    # the lane axis:  ones(8, D) . p(TB, D)^T -> (8, TB); every row equals the
    # row-wise dot.  (MXU is otherwise idle here, so this is free.)
    ones = jnp.ones((8, p.shape[1]), jnp.float32)
    s = jax.lax.dot_general(ones, p, (((1,), (1,)), ((), ())),
                            preferred_element_type=jnp.float32)  # (8, TB)
    s_row = s[0:1, :]                                            # (1, TB)
    o_ref[...] = 1.0 / (1.0 + jnp.exp(-s_row))                   # sigmoid


def mf_forward_scores(users_emb, items_emb, *, tb=512):
    """sigmoid(sum(users_emb * items_emb, axis=1)) -> (B,) via Pallas."""
    assert users_emb.shape == items_emb.shape
    b, d = users_emb.shape
    tb = min(tb, _round_up(b, 128))     # lane-dense output tile, >= 128 wide
    b_pad = _round_up(b, tb)
    if b_pad != b:
        pad = ((0, b_pad - b), (0, 0))
        users_emb = jnp.pad(users_emb, pad)
        items_emb = jnp.pad(items_emb, pad)
    out = pl.pallas_call(
        _score_kernel,
        out_shape=jax.ShapeDtypeStruct((1, b_pad), jnp.float32),
        grid_spec=pltpu.PrefetchScalarGridSpec(
            num_scalar_prefetch=0,
            grid=(b_pad // tb,),
            in_specs=[
                pl.BlockSpec((tb, d), lambda i: (i, 0)),
                pl.BlockSpec((tb, d), lambda i: (i, 0)),
            ],
            out_specs=pl.BlockSpec((1, tb), lambda i: (0, i)),
        ),
        compiler_params=pltpu.CompilerParams(
            dimension_semantics=("parallel",)),
        cost_estimate=pl.CostEstimate(
            flops=2 * b_pad * d,
            transcendentals=b_pad,
            bytes_accessed=4 * (2 * b_pad * d + b_pad)),
    )(users_emb, items_emb)
    return out[0, :b]


# ----------------------------------------------------------------------------
# Kernel 2: tiled MXU matmul + sigmoid                 (PureMF.getUsersRating)
# ----------------------------------------------------------------------------
def _rating_kernel(u_ref, it_ref, o_ref):
    # u_ref: (TB, D), it_ref: (D, TM) (item table pre-transposed at init),
    # o_ref: (TB, TM) lane-dense, bf16 by default; accumulate in f32.
    s = jnp.dot(u_ref[...], it_ref[...], preferred_element_type=jnp.float32)
    # sigmoid = exp (EUP) + approx reciprocal (EUP) — no VALU divide sequence.
    o_ref[...] = pl.reciprocal(1.0 + jnp.exp(-s), approx=True).astype(o_ref.dtype)


def mf_users_rating(users_emb, item_table_t, num_items, *, tb=512, tm=2048,
                    out_dtype=jnp.bfloat16):
    """sigmoid(users_emb @ item_table.T) -> (B, M) via Pallas tiled matmul.

    `item_table_t` is the item embedding table already transposed and padded to
    (D, M_pad) with M_pad % tm == 0 (done once at model init).
    """
    b, d = users_emb.shape
    d2, m_pad = item_table_t.shape
    assert d == d2 and num_items <= m_pad
    tm = min(tm, m_pad)
    assert m_pad % tm == 0, "item table must be pre-padded to a tile multiple"
    tb = min(tb, _round_up(b, 16))      # sublane-aligned (also for bf16 out)
    b_pad = _round_up(b, tb)
    if b_pad != b:
        users_emb = jnp.pad(users_emb, ((0, b_pad - b), (0, 0)))
    n_bi = b_pad // tb
    in_bytes = users_emb.dtype.itemsize
    out_bytes = 2 if out_dtype == jnp.bfloat16 else 4
    out = pl.pallas_call(
        _rating_kernel,
        out_shape=jax.ShapeDtypeStruct((b_pad, m_pad), out_dtype),
        grid_spec=pltpu.PrefetchScalarGridSpec(
            num_scalar_prefetch=0,
            grid=(n_bi, m_pad // tm),
            in_specs=[
                pl.BlockSpec((tb, d), lambda i, j: (i, 0)),
                pl.BlockSpec((d, tm), lambda i, j: (0, j)),
            ],
            out_specs=pl.BlockSpec((tb, tm), lambda i, j: (i, j)),
        ),
        compiler_params=pltpu.CompilerParams(
            dimension_semantics=("parallel", "parallel")),
        cost_estimate=pl.CostEstimate(
            flops=2 * b_pad * m_pad * d,
            transcendentals=b_pad * m_pad,
            bytes_accessed=(in_bytes * b_pad * d
                            + in_bytes * m_pad * d * n_bi   # table re-streamed per batch tile
                            + out_bytes * b_pad * m_pad)),
    )(users_emb, item_table_t)
    return out[:b, :num_items]


# ----------------------------------------------------------------------------
# PureMF (JAX/Pallas port)
# ----------------------------------------------------------------------------
class PureMFPallas:
    def __init__(self, num_users, num_items, latent_dim, key,
                 param_dtype=jnp.float32,       # bf16 recommended on v5e
                 rating_tile_m=2048,
                 rating_out_dtype=jnp.bfloat16):
        self.num_users = num_users
        self.num_items = num_items
        self.latent_dim = latent_dim
        self.rating_out_dtype = rating_out_dtype
        k_u, k_i = jax.random.split(key)
        # "using Normal distribution N(0,1) initialization for PureMF"
        self.embedding_user = jax.random.normal(
            k_u, (num_users, latent_dim)).astype(param_dtype)
        self.embedding_item = jax.random.normal(
            k_i, (num_items, latent_dim)).astype(param_dtype)
        # Hoist the getUsersRating pad + transpose to init (one-time cost):
        # stored as (D, M_pad) so the kernel RHS needs no per-call HBM round trip.
        self._rating_tm = min(rating_tile_m, _round_up(num_items, 128))
        m_pad = _round_up(num_items, self._rating_tm)
        self.embedding_item_t = jnp.pad(
            self.embedding_item, ((0, m_pad - num_items), (0, 0))).T  # (D, M_pad)

    # TODO(synk): the data-dependent embedding row gathers stay in plain JAX;
    # fusing them into the kernels would need per-row DMA (slower than XLA gather).
    def forward(self, users, items):
        users_emb = jnp.take(self.embedding_user, users, axis=0)   # (B, D)
        items_emb = jnp.take(self.embedding_item, items, axis=0)   # (B, D)
        return mf_forward_scores(users_emb, items_emb)

    def getUsersRating(self, users):
        users_emb = jnp.take(self.embedding_user, users, axis=0)   # (B, D)
        return mf_users_rating(users_emb, self.embedding_item_t, self.num_items,
                               tm=self._rating_tm,
                               out_dtype=self.rating_out_dtype)

    # pure-JAX references for validation
    def forward_ref(self, users, items):
        u = jnp.take(self.embedding_user, users, axis=0).astype(jnp.float32)
        i = jnp.take(self.embedding_item, items, axis=0).astype(jnp.float32)
        return jax.nn.sigmoid(jnp.sum(u * i, axis=1))

    def getUsersRating_ref(self, users):
        u = jnp.take(self.embedding_user, users, axis=0).astype(jnp.float32)
        it = self.embedding_item.astype(jnp.float32)
        return jax.nn.sigmoid(u @ it.T)


if __name__ == "__main__":
    key = jax.random.PRNGKey(0)
    k_model, k_users, k_items = jax.random.split(key, 3)

    num_users, num_items = 64, 300      # non-multiples of 128 exercise padding
    latent_dim = 32
    batch = 8

    model = PureMFPallas(num_users, num_items, latent_dim, k_model)

    users = jax.random.randint(k_users, (batch,), 0, num_users, dtype=jnp.int32)
    items = jax.random.randint(k_items, (batch,), 0, num_items, dtype=jnp.int32)

    # forward: sigmoid(row-wise dot)
    scores = model.forward(users, items)
    jax.block_until_ready(scores)
    assert scores.shape == (batch,)
    assert jnp.allclose(scores, model.forward_ref(users, items),
                        atol=1e-5, rtol=1e-5)

    # getUsersRating: sigmoid(users_emb @ item_table.T), bf16 output
    ratings = model.getUsersRating(users)
    jax.block_until_ready(ratings)
    assert ratings.shape == (batch, num_items)
    assert ratings.dtype == jnp.bfloat16
    assert jnp.allclose(ratings.astype(jnp.float32),
                        model.getUsersRating_ref(users),
                        atol=1e-2, rtol=1e-2)

    print("KERNEL_OK")
</pallas_src>

<mosaic_0001>
module attributes {stable_mosaic.version = 11 : i64} {
  func.func @_score_kernel(%arg0: i32, %arg1: memref<128x32xf32, #tpu.memory_space<vmem>>, %arg2: memref<128x32xf32, #tpu.memory_space<vmem>>, %arg3: memref<1x128xf32, #tpu.memory_space<vmem>>) attributes {dimension_semantics = [#tpu.dimension_semantics<parallel>], iteration_bounds = array<i64: 1>, scalar_prefetch = 0 : i64, scratch_operands = 0 : i64, tpu.core_type = #tpu.core_type<tc>, window_params = [{transform_indices = @transform_0, window_bounds = array<i64: 128, 32>}, {transform_indices = @transform_1, window_bounds = array<i64: 128, 32>}, {transform_indices = @transform_2, window_bounds = array<i64: 1, 128>}]} {
    %c0 = arith.constant 0 : index
    %c0_0 = arith.constant 0 : index
    %0 = vector.load %arg1[%c0, %c0_0] : memref<128x32xf32, #tpu.memory_space<vmem>>, vector<128x32xf32>
    %c0_1 = arith.constant 0 : index
    %c0_2 = arith.constant 0 : index
    %1 = vector.load %arg2[%c0_1, %c0_2] : memref<128x32xf32, #tpu.memory_space<vmem>>, vector<128x32xf32>
    %2 = arith.mulf %0, %1 : vector<128x32xf32>
    %cst = arith.constant 1.000000e+00 : f32
    %3 = vector.broadcast %cst : f32 to vector<8x32xf32>
    %cst_3 = arith.constant dense<0.000000e+00> : vector<8x128xf32>
    %4 = tpu.matmul %3, %2, %cst_3 {dimension_numbers = #tpu.dot_dimension_numbers<[1], [1], [0], [0], [0, 0, 1, 0], [], []>} : vector<8x32xf32>, vector<128x32xf32>, vector<8x128xf32> -> vector<8x128xf32>
    %5 = vector.extract_strided_slice %4 {offsets = [0, 0], sizes = [1, 128], strides = [1, 1]} : vector<8x128xf32> to vector<1x128xf32>
    %cst_4 = arith.constant 0.000000e+00 : f32
    %6 = vector.broadcast %cst_4 : f32 to vector<1x128xf32>
    %7 = arith.subf %6, %5 : vector<1x128xf32>
    %8 = math.exp %7 : vector<1x128xf32>
    %cst_5 = arith.constant 1.000000e+00 : f32
    %9 = vector.broadcast %cst_5 : f32 to vector<1x128xf32>
    %10 = arith.addf %9, %8 : vector<1x128xf32>
    %cst_6 = arith.constant 1.000000e+00 : f32
    %11 = vector.broadcast %cst_6 : f32 to vector<1x128xf32>
    %12 = arith.divf %11, %10 : vector<1x128xf32>
    %c0_7 = arith.constant 0 : index
    %c0_8 = arith.constant 0 : index
    %13 = vector.load %arg3[%c0_7, %c0_8] : memref<1x128xf32, #tpu.memory_space<vmem>>, vector<1x128xf32>
    tpu.vector_store %arg3[%c0_7, %c0_8], %12 {strides = array<i32>} : memref<1x128xf32, #tpu.memory_space<vmem>>, vector<1x128xf32>,
    return
  }
  func.func @transform_0(%arg0: i32) -> (i32, i32) {
    %c0_i32 = arith.constant 0 : i32
    %c0_i32_0 = arith.constant 0 : i32
    return %arg0, %c0_i32 : i32, i32
  }
  func.func @transform_1(%arg0: i32) -> (i32, i32) {
    %c0_i32 = arith.constant 0 : i32
    %c0_i32_0 = arith.constant 0 : i32
    return %arg0, %c0_i32 : i32, i32
  }
  func.func @transform_2(%arg0: i32) -> (i32, i32) {
    %c0_i32 = arith.constant 0 : i32
    %c0_i32_0 = arith.constant 0 : i32
    return %c0_i32, %arg0 : i32, i32
  }
}

</mosaic_0001>

<bundles_post_ra>
// kernel: tpu_custom_call.1
= control target key start
LH: loop header
LB: loop body
LE: loop exit
PB: predicated region body
PF: predicated region fallthrough
CT: control target
= control target key end

     0   :  { %vm60_vm0 = vcmask 261120   ;;  %v302_v3 = vmov 0.0   ;;  %vm303_vm1 = vmmov 0   ;;  %s454_s0 = inlined_call_operand.vmem [shape: f32[128,32], index: 0, kind: input, shape index: {}]   ;;  %s455_s1 = inlined_call_operand.vmem [shape: f32[128,32], index: 1, kind: input, shape index: {}]   ;;  %s456_s2 = inlined_call_operand.hbm [shape: f32[1,128], index: 2, kind: output, shape index: {}]  }
   0x1   :  { %v27_v0 = vld [vmem:[%s454_s0 + $0x78] sm:$0xff]  ;;  %v26_v2 = vld [vmem:[%s454_s0 + $0x70] sm:$0xff]  ;;  %237 = vmatprep.subr.mxu0 %v302_v3  ;;  %269 = vmatprep.mubr.msk.f32.mxu0 %vm303_vm1, %v302_v3  ;;  %v25_v7 = vld [vmem:[%s454_s0 + $0x68] sm:$0xff] }
   0x2   :  { %v43_v1 = vld [vmem:[%s455_s1 + $0x78] sm:$0xff]  ;;  %v42_v5 = vld [vmem:[%s455_s1 + $0x70] sm:$0xff]  ;;  %v41_v8 = vld [vmem:[%s455_s1 + $0x68] sm:$0xff] }
   0x3   :  { %v59_v4 = vmul.f32 %v43_v1, %v27_v0  ;;  %v58_v6 = vmul.f32 %v42_v5, %v26_v2  ;;  %v57_v9 = vmul.f32 %v41_v8, %v25_v7  ;;  %v24_v10 = vld [vmem:[%s454_s0 + $0x60] sm:$0xff] }
   0x4   :  { %v40_v11 = vld [vmem:[%s455_s1 + $0x60] sm:$0xff] }
   0x5   :  { %238 = vmatpush3.xpose.msk.msra.mxu0 %vm60_vm0, %v59_v4 }
   0x6   :  { %239 = vmatprep.subr.mxu0 %v302_v3 }
   0x9   :  { %240 = vmatpush3.xpose.msk.msra.mxu0 %vm60_vm0, %v58_v6 }
   0xa   :  { %241 = vmatprep.subr.mxu0 %v302_v3 }
   0xb   :  { %7 = vsyncpa [#allocation3], 0  ;;  %v56_v12 = vmul.f32 %v40_v11, %v24_v10  ;;  %v23_v13 = vld [vmem:[%s454_s0 + $0x58] sm:$0xff]  ;;  %v22_v16 = vld [vmem:[%s454_s0 + $0x50] sm:$0xff]  ;;  %v304_v49 = vmov 1.0  }
   0xc   :  { %v39_v14 = vld [vmem:[%s455_s1 + $0x58] sm:$0xff]  ;;  %v38_v17 = vld [vmem:[%s455_s1 + $0x50] sm:$0xff]  ;;  %v21_v19 = vld [vmem:[%s454_s0 + $0x48] sm:$0xff] }
   0xd   :  { %242 = vmatpush3.xpose.msk.msra.mxu0 %vm60_vm0, %v57_v9  ;;  %v55_v15 = vmul.f32 %v39_v14, %v23_v13  ;;  %v54_v18 = vmul.f32 %v38_v17, %v22_v16  ;;  %v37_v20 = vld [vmem:[%s455_s1 + $0x48] sm:$0xff]  ;;  %v20_v22 = vld [vmem:[%s454_s0 + $0x40] sm:$0xff]  ;;  %v19_v25 = vld [vmem:[%s454_s0 + $0x38] sm:$0xff] }
   0xe   :  { %243 = vmatprep.subr.mxu0 %v302_v3  ;;  %v53_v21 = vmul.f32 %v37_v20, %v21_v19  ;;  %v36_v23 = vld [vmem:[%s455_s1 + $0x40] sm:$0xff]  ;;  %v35_v26 = vld [vmem:[%s455_s1 + $0x38] sm:$0xff]  ;;  %v18_v28 = vld [vmem:[%s454_s0 + $0x30] sm:$0xff] }
   0xf   :  { %v52_v24 = vmul.f32 %v36_v23, %v20_v22  ;;  %v51_v27 = vmul.f32 %v35_v26, %v19_v25  ;;  %v34_v29 = vld [vmem:[%s455_s1 + $0x30] sm:$0xff]  ;;  %v17_v31 = vld [vmem:[%s454_s0 + $0x28] sm:$0xff]  ;;  %v16_v34 = vld [vmem:[%s454_s0 + $0x20] sm:$0xff] }
  0x10   :  { %v50_v30 = vmul.f32 %v34_v29, %v18_v28  ;;  %v33_v32 = vld [vmem:[%s455_s1 + $0x28] sm:$0xff]  ;;  %v32_v35 = vld [vmem:[%s455_s1 + $0x20] sm:$0xff]  ;;  %v15_v37 = vld [vmem:[%s454_s0 + $0x18] sm:$0xff] }
  0x11   :  { %244 = vmatpush3.xpose.msk.msra.mxu0 %vm60_vm0, %v56_v12  ;;  %v49_v33 = vmul.f32 %v33_v32, %v17_v31  ;;  %v48_v36 = vmul.f32 %v32_v35, %v16_v34  ;;  %v31_v38 = vld [vmem:[%s455_s1 + $0x18] sm:$0xff]  ;;  %v14_v40 = vld [vmem:[%s454_s0 + $0x10] sm:$0xff]  ;;  %v13_v43 = vld [vmem:[%s454_s0 + $0x8] sm:$0xff] }
  0x12   :  { %245 = vmatprep.subr.mxu0 %v302_v3  ;;  %v47_v39 = vmul.f32 %v31_v38, %v15_v37  ;;  %v30_v41 = vld [vmem:[%s455_s1 + $0x10] sm:$0xff]  ;;  %v29_v44 = vld [vmem:[%s455_s1 + $0x8] sm:$0xff]  ;;  %v12_v46 = vld [vmem:[%s454_s0] sm:$0xff]  ;;  %s305_s0 = smov [#allocation2]  }
  0x13   :  { %v46_v42 = vmul.f32 %v30_v41, %v14_v40  ;;  %v45_v45 = vmul.f32 %v29_v44, %v13_v43  ;;  %v28_v47 = vld [vmem:[%s455_s1] sm:$0xff]  ;;  %s195_s1 = sshll.u32 %s305_s0, 4  ;;  %s196_s1 = int_to_ptr.vmem [resolvable:$true] %s195_s1 }
  0x14   :  { %v44_v48 = vmul.f32 %v28_v47, %v12_v46  ;;  %s280_s17 = scalar_lea.vmem %s196_s1, 16  ;;  %s284_s18 = scalar_lea.vmem %s196_s1, 32 }
  0x15   :  { %246 = vmatpush3.xpose.msk.msra.mxu0 %vm60_vm0, %v55_v15  ;;  %p281_p0 = scmp.ne.s32.totalorder %s196_s1, %s280_s17  ;;  %p285_p1 = scmp.lt.s32.totalorder %s196_s1, %s196_s1 }
  0x16   :  { %247 = vmatprep.subr.mxu0 %v302_v3  ;;  %p286_p2 = scmp.lt.s32.totalorder %s284_s18, %s280_s17 }
  0x18   :  { %p287_p3 = por %p286_p2, %p285_p1 }
  0x19   :  { %248 = vmatpush3.xpose.msk.msra.mxu0 %vm60_vm0, %v54_v18 }
  0x1a   :  { %249 = vmatprep.subr.mxu0 %v302_v3  ;;  %p288_p4 = pnand %p287_p3, %p281_p0 }
  0x1d   :  { %250 = vmatpush3.xpose.msk.msra.mxu0 %vm60_vm0, %v53_v21 }
  0x1e   :  { %251 = vmatprep.subr.mxu0 %v302_v3 }
  0x21   :  { %252 = vmatpush3.xpose.msk.msra.mxu0 %vm60_vm0, %v52_v24 }
  0x22   :  { %253 = vmatprep.subr.mxu0 %v302_v3 }
  0x25   :  { %254 = vmatpush3.xpose.msk.msra.mxu0 %vm60_vm0, %v51_v27 }
  0x26   :  { %255 = vmatprep.subr.mxu0 %v302_v3 }
  0x29   :  { %256 = vmatpush3.xpose.msk.msra.mxu0 %vm60_vm0, %v50_v30 }
  0x2a   :  { %257 = vmatprep.subr.mxu0 %v302_v3 }
  0x2d   :  { %258 = vmatpush3.xpose.msk.msra.mxu0 %vm60_vm0, %v49_v33 }
  0x2e   :  { %259 = vmatprep.subr.mxu0 %v302_v3 }
  0x31   :  { %260 = vmatpush3.xpose.msk.msra.mxu0 %vm60_vm0, %v48_v36 }
  0x32   :  { %261 = vmatprep.subr.mxu0 %v302_v3 }
  0x35   :  { %262 = vmatpush3.xpose.msk.msra.mxu0 %vm60_vm0, %v47_v39 }
  0x36   :  { %263 = vmatprep.subr.mxu0 %v302_v3 }
  0x39   :  { %264 = vmatpush3.xpose.msk.msra.mxu0 %vm60_vm0, %v46_v42 }
  0x3a   :  { %265 = vmatprep.subr.mxu0 %v302_v3 }
  0x3d   :  { %266 = vmatpush3.xpose.msk.msra.mxu0 %vm60_vm0, %v45_v45 }
  0x3e   :  { %267 = vmatprep.subr.mxu0 %v302_v3 }
  0x41   :  { %268 = vmatpush3.xpose.msk.msra.mxu0 %vm60_vm0, %v44_v48 }
  0x44   :  { %270 = vmatmul.mubr.msk.f32.vlgmr.msra.gmra.mxu0 %vm60_vm0, %v304_v49 }
 0x104   :  { %v178_v50 = vpop.f32.mrf.mxu0 }
 0x105   :  { %v182_v51 = vsub.f32 0.0, %v178_v50 }
 0x106   :  { %v271_v52 = vpop.f32.mrf.mxu0 }
 0x107   :  { %v183_v53 = vmul.f32 1.442695, %v182_v51 }
 0x109   :  { %276 = vpow2.f32 %v183_v53 }
 0x116   :  { %v277_v54 = vpop.eup %276 }
 0x117   :  { %v185_v55 = vadd.f32 1.0, %v277_v54 }
 0x119   :  { %278 = vrcp.f32 %v185_v55 }
 0x126   :  { %v279_v56 = vpop.eup %278 }
 0x127   :  { %188 = vst [vmem:[#allocation2] sm:$0x1] %v279_v56 }
 0x128   :  { %291 = shalt.err (!%p288_p4)
}
 0x129   :  { %198 = dma.vmem_to_hbm [thread:$0]  %s196_s1, 16, %s456_s2, [#allocation3]  }
 0x12a   :  { %300 = dma.done.wait [#allocation3], 16  }
 0x12b   :  { %301 = vsyncadd [#allocation3], 4294967280 }
 0x12c   :  { %202 = vsyncpa [#allocation3], 1 }

</bundles_post_ra>
